<compile_context>
chip_gen: v7x
topology: tpu7x:2x2x1
jax: 0.10.0
libtpu: 0.0.40
codegen_flags: <defaults>
</compile_context>

<pallas_src>
import jax
import jax.numpy as jnp
from jax.experimental import pallas as pl
from jax.experimental.pallas import tpu as pltpu


# ---------------------------- Pallas kernel ----------------------------

def _blurpool_kernel(x_ref, awt_ref, aht_ref, o_ref):
    """Fused reflect-pad + depthwise 3x3 blur + stride-2 downsample.

    x_ref:   (1, TC, H, W)    input channel tile (NCHW native)
    awt_ref: (W, Wo)          A_w^T  (blur+stride along W, reflect folded in)
    aht_ref: (H, Ho)          A_h^T  (blur+stride along H, reflect folded in)
    o_ref:   (1, TC, Ho*Wo)   lane-dense output slab
    """
    tc, h, w = x_ref.shape[1], x_ref.shape[2], x_ref.shape[3]
    wo = awt_ref.shape[1]
    ho = aht_ref.shape[1]
    hi = jax.lax.Precision.HIGHEST

    # Blur + stride along W:  (TC*H, W) @ (W, Wo) -> (TC*H, Wo)
    x2 = x_ref[0].reshape(tc * h, w)
    y = jnp.dot(x2, awt_ref[...], preferred_element_type=jnp.float32, precision=hi)

    # Blur + stride along H: bring H onto the contraction axis, then matmul.
    yt = jnp.transpose(y.reshape(tc, h, wo), (0, 2, 1)).reshape(tc * wo, h)
    z = jnp.dot(yt, aht_ref[...], preferred_element_type=jnp.float32, precision=hi)

    out = jnp.transpose(z.reshape(tc, wo, ho), (0, 2, 1))        # (TC, Ho, Wo)
    o_ref[0] = out.reshape(tc, ho * wo).astype(o_ref.dtype)


# ---------------------------- host-side helpers ----------------------------

def _blur_matrix(size, stride):
    """A (out, size) matrix folding reflect-pad(1) + [1,2,1]/4 filter + stride."""
    assert size >= 2, "reflect padding of 1 needs spatial size >= 2"
    out = (size - 1) // stride + 1
    # padded index t in [0, size+1] -> source index (PyTorch 'reflect', excludes edge)
    pad_idx = jnp.concatenate([
        jnp.array([1], jnp.int32),
        jnp.arange(size, dtype=jnp.int32),
        jnp.array([size - 2], jnp.int32)])
    filt = jnp.array([0.25, 0.5, 0.25], jnp.float32)
    taps = (stride * jnp.arange(out, dtype=jnp.int32)[:, None]
            + jnp.arange(3, dtype=jnp.int32)[None, :])            # (out, 3) padded idx
    src = pad_idx[taps]                                           # (out, 3) source idx
    onehot = (src[:, :, None]
              == jnp.arange(size, dtype=jnp.int32)[None, None, :]).astype(jnp.float32)
    return jnp.sum(onehot * filt[None, :, None], axis=1)          # (out, size)


def _channel_tile(c):
    if c <= 128:
        return c
    for t in (128, 64, 32, 16, 8, 4, 2, 1):
        if c % t == 0:
            return t
    return 1


def downsample_forward(x_nchw, stride=2, filt_size=3):
    """Forward pass of TResNet Downsample (filt_size=3) on NCHW input."""
    assert filt_size == 3
    n, c, h, w = x_nchw.shape
    ho = (h - 1) // stride + 1
    wo = (w - 1) // stride + 1

    awt = _blur_matrix(w, stride).T        # (W, Wo)
    aht = _blur_matrix(h, stride).T        # (H, Ho)

    tc = _channel_tile(c)
    x = x_nchw.astype(jnp.float32)

    out_flat = pl.pallas_call(
        _blurpool_kernel,
        grid=(n, c // tc),
        in_specs=[
            pl.BlockSpec((1, tc, h, w), lambda ni, ci: (ni, ci, 0, 0)),
            pl.BlockSpec((w, wo), lambda ni, ci: (0, 0)),
            pl.BlockSpec((h, ho), lambda ni, ci: (0, 0)),
        ],
        out_specs=pl.BlockSpec((1, tc, ho * wo), lambda ni, ci: (ni, ci, 0)),
        out_shape=jax.ShapeDtypeStruct((n, c, ho * wo), x_nchw.dtype),
        compiler_params=pltpu.CompilerParams(
            dimension_semantics=("parallel", "parallel"),
            vmem_limit_bytes=32 * 1024 * 1024),
    )(x, awt, aht)

    return out_flat.reshape(n, c, ho, wo)


# ---------------------------- pure-JAX reference ----------------------------

def reference_forward(x_nchw, stride=2):
    n, c, h, w = x_nchw.shape
    f1 = jnp.array([1.0, 2.0, 1.0], jnp.float32)
    f2 = f1[:, None] * f1[None, :]
    f2 = f2 / jnp.sum(f2)
    weight = jnp.broadcast_to(f2, (c, 1, 3, 3))                  # depthwise, OIHW
    xpad = jnp.pad(x_nchw.astype(jnp.float32),
                   ((0, 0), (0, 0), (1, 1), (1, 1)), mode="reflect")
    return jax.lax.conv_general_dilated(
        xpad, weight, window_strides=(stride, stride), padding="VALID",
        dimension_numbers=("NCHW", "OIHW", "NCHW"),
        feature_group_count=c,
        precision=jax.lax.Precision.HIGHEST)


# ---------------------------- main ----------------------------

if __name__ == "__main__":
    N, C, H, W = 2, 8, 16, 16
    key = jax.random.PRNGKey(0)
    x = jax.random.normal(key, (N, C, H, W), jnp.float32)

    out = jax.block_until_ready(downsample_forward(x))
    ref = jax.block_until_ready(reference_forward(x))

    assert out.shape == (N, C, H // 2, W // 2), out.shape
    err = float(jnp.max(jnp.abs(out - ref)))
    assert err < 1e-4, f"max abs err {err}"
    print("KERNEL_OK")
</pallas_src>

<mosaic_0001>
module attributes {stable_mosaic.version = 11 : i64} {
  func.func @_blurpool_kernel(%arg0: i32, %arg1: i32, %arg2: memref<1x8x16x16xf32, #tpu.memory_space<vmem>>, %arg3: memref<16x8xf32, #tpu.memory_space<vmem>>, %arg4: memref<16x8xf32, #tpu.memory_space<vmem>>, %arg5: memref<1x8x64xf32, #tpu.memory_space<vmem>>) attributes {dimension_semantics = [#tpu.dimension_semantics<parallel>, #tpu.dimension_semantics<parallel>], iteration_bounds = array<i64: 2, 1>, scalar_prefetch = 0 : i64, scratch_operands = 0 : i64, tpu.core_type = #tpu.core_type<tc>, window_params = [{transform_indices = @transform_0, window_bounds = array<i64: 1, 8, 16, 16>}, {pipeline_mode = #tpu.pipeline_mode<synchronous>, transform_indices = @transform_1, window_bounds = array<i64: 16, 8>}, {pipeline_mode = #tpu.pipeline_mode<synchronous>, transform_indices = @transform_2, window_bounds = array<i64: 16, 8>}, {transform_indices = @transform_3, window_bounds = array<i64: 1, 8, 64>}]} {
    %c0 = arith.constant 0 : index
    %c0_0 = arith.constant 0 : index
    %c0_1 = arith.constant 0 : index
    %c0_2 = arith.constant 0 : index
    %0 = vector.load %arg2[%c0, %c0_0, %c0_1, %c0_2] : memref<1x8x16x16xf32, #tpu.memory_space<vmem>>, vector<1x8x16x16xf32>
    %1 = vector.shape_cast %0 : vector<1x8x16x16xf32> to vector<8x16x16xf32>
    %2 = vector.shape_cast %1 : vector<8x16x16xf32> to vector<128x16xf32>
    %c0_3 = arith.constant 0 : index
    %c0_4 = arith.constant 0 : index
    %3 = vector.load %arg3[%c0_3, %c0_4] : memref<16x8xf32, #tpu.memory_space<vmem>>, vector<16x8xf32>
    %cst = arith.constant dense<0.000000e+00> : vector<128x8xf32>
    %4 = tpu.matmul %2, %3, %cst {dimension_numbers = #tpu.dot_dimension_numbers<[1], [0], [0], [1], [0, 0, 1, 1], [], []>, precision = #tpu.contract_precision<fp32>} : vector<128x16xf32>, vector<16x8xf32>, vector<128x8xf32> -> vector<128x8xf32>
    %5 = vector.shape_cast %4 : vector<128x8xf32> to vector<8x16x8xf32>
    %6 = tpu.transpose %5, [0, 2, 1] : vector<8x16x8xf32> -> vector<8x8x16xf32>
    %7 = vector.shape_cast %6 : vector<8x8x16xf32> to vector<64x16xf32>
    %c0_5 = arith.constant 0 : index
    %c0_6 = arith.constant 0 : index
    %8 = vector.load %arg4[%c0_5, %c0_6] : memref<16x8xf32, #tpu.memory_space<vmem>>, vector<16x8xf32>
    %cst_7 = arith.constant dense<0.000000e+00> : vector<64x8xf32>
    %9 = tpu.matmul %7, %8, %cst_7 {dimension_numbers = #tpu.dot_dimension_numbers<[1], [0], [0], [1], [0, 0, 1, 1], [], []>, precision = #tpu.contract_precision<fp32>} : vector<64x16xf32>, vector<16x8xf32>, vector<64x8xf32> -> vector<64x8xf32>
    %10 = vector.shape_cast %9 : vector<64x8xf32> to vector<8x8x8xf32>
    %11 = tpu.transpose %10, [0, 2, 1] : vector<8x8x8xf32> -> vector<8x8x8xf32>
    %12 = vector.shape_cast %11 : vector<8x8x8xf32> to vector<8x64xf32>
    %c0_8 = arith.constant 0 : index
    %c0_9 = arith.constant 0 : index
    %c0_10 = arith.constant 0 : index
    %13 = vector.load %arg5[%c0_8, %c0_9, %c0_10] : memref<1x8x64xf32, #tpu.memory_space<vmem>>, vector<1x8x64xf32>
    %14 = vector.shape_cast %13 : vector<1x8x64xf32> to vector<8x64xf32>
    %15 = vector.shape_cast %12 : vector<8x64xf32> to vector<1x8x64xf32>
    tpu.vector_store %arg5[%c0_8, %c0_9, %c0_10], %15 {strides = array<i32>} : memref<1x8x64xf32, #tpu.memory_space<vmem>>, vector<1x8x64xf32>,
    return
  }
  func.func @transform_0(%arg0: i32, %arg1: i32) -> (i32, i32, i32, i32) {
    %c0_i32 = arith.constant 0 : i32
    %c0_i32_0 = arith.constant 0 : i32
    %c0_i32_1 = arith.constant 0 : i32
    return %arg0, %arg1, %c0_i32, %c0_i32_0 : i32, i32, i32, i32
  }
  func.func @transform_1(%arg0: i32, %arg1: i32) -> (i32, i32) {
    %c0_i32 = arith.constant 0 : i32
    %c0_i32_0 = arith.constant 0 : i32
    %c0_i32_1 = arith.constant 0 : i32
    return %c0_i32, %c0_i32_0 : i32, i32
  }
  func.func @transform_2(%arg0: i32, %arg1: i32) -> (i32, i32) {
    %c0_i32 = arith.constant 0 : i32
    %c0_i32_0 = arith.constant 0 : i32
    %c0_i32_1 = arith.constant 0 : i32
    return %c0_i32, %c0_i32_0 : i32, i32
  }
  func.func @transform_3(%arg0: i32, %arg1: i32) -> (i32, i32, i32) {
    %c0_i32 = arith.constant 0 : i32
    %c0_i32_0 = arith.constant 0 : i32
    return %arg0, %arg1, %c0_i32 : i32, i32, i32
  }
}

</mosaic_0001>

<bundles_post_ra>
// kernel: tpu_custom_call.1
= control target key start
LH: loop header
LB: loop body
LE: loop exit
PB: predicated region body
PF: predicated region fallthrough
CT: control target
= control target key end

     0   :  { %8 = vsyncpa [#allocation3], 0  ;;  %s4373_s0 = inlined_call_operand.hbm [shape: f32[2,8,16,16], index: 0, kind: input, shape index: {}]   ;;  %s4374_s1 = inlined_call_operand.vmem [shape: f32[16,8], index: 1, kind: input, shape index: {}]   ;;  %s4375_s2 = inlined_call_operand.vmem [shape: f32[16,8], index: 2, kind: input, shape index: {}]   ;;  %s4376_s3 = inlined_call_operand.hbm [shape: f32[2,8,64], index: 3, kind: output, shape index: {}]  }
   0x1   :  { %10 = vsyncpa [#allocation3 + $0x1], 0 }
   0x2   :  { %11 = vsyncpa [#allocation4], 0 }
   0x3   :  { %13 = vsyncpa [#allocation4 + $0x1], 0  ;;  %s3792_s12 = smov 0   ;;  %s3794_s13 = smov 0  }
   0x4   :  { %s3796_s14 = smov 0   ;;  %s3798_s15 = smov 0  }
   0x5   :  { %s3800_s16 = smov 0   ;;  %s3802_s17 = smov 0  }
   0x6 LB: > { %s2954_s18 = sadd.s32 4294967295, %s3757_s17   ;;  %s2955_s19 = sadd.s32 4294967294, %s3757_s17   ;;  %s3757_s17 = sphi %s3802_s17, %s19_s17   ;;  %s3753_s16 = sphi %s3800_s16, %s4391_s16   ;;  %s3749_s15 = sphi %s3798_s15, %s4390_s15   ;;  %s3745_s14 = sphi %s3796_s14, %s4389_s14   ;;  %s3741_s13 = sphi %s3794_s13, %s4388_s13   ;;  %s3737_s12 = sphi %s3792_s12, %s4387_s12  }
   0x7   : > { %s31_s20 = sadd.s32 1, %s3753_s16  ;;  %s40_s21 = sadd.s32 1, %s3745_s14 }
   0x8   : > { %p33_p0 = scmp.ge.s32.totalorder %s31_s20, 2  ;;  %p47_p1 = scmp.ne.s32.totalorder %s3745_s14, %s3741_s13 }
   0x9   : > { %p48_p2 = scmp.eq.s32.totalorder %s3757_s17, 0  ;;  %p53_p3 = scmp.ne.s32.totalorder %s3741_s13, %s3737_s12 }
   0xa   : > { %s4393_s20 = smov (%p33_p0, %s31_s20), 0  ;;  %p54_p5 = scmp.eq.s32.totalorder %s2954_s18, 0 }
   0xb   : > { %p3833_p4 = por %p48_p2, %p47_p1  ;;  %s35_s23 = ssub.s32 %s3753_s16, %s4393_s20 }
   0xc   : > { %p121_p6 = scmp.eq.s32.totalorder %s2954_s18, 1  ;;  %p38_p7 = scmp.eq.s32.totalorder %s35_s23, 0 }
   0xd   : > { %p3839_p8 = por %p54_p5, %p53_p3  ;;  %p127_p10 = scmp.eq.s32.totalorder %s2955_s19, 1 }
   0xe   : > { %p3843_p9 = por %p121_p6, %p47_p1  ;;  %p3583_p13 = scmp.lt.s32.totalorder %s3757_s17, 2 }
   0xf   : > { %s3848_s26 = scalar_select %p38_p7, %s3745_s14, %s40_s21  }
  0x10   : > { %s4380_s25 = scalar_select %p3843_p9, 1, 0 }
  0x11   : > { %p3850_p11 = por %p127_p10, %p53_p3  ;;  %s153_s28 = sand.u32 1, %s3745_s14  }
  0x12   : > { %s2958_s29 = sshll.u32 %s153_s28, 7  ;;  %s2968_s30 = sshll.u32 %s3753_s16, 11 }
  0x13   : > { %s4381_s27 = scalar_select %p3850_p11, 1, 0 }
  0x14   : > { %s3861_s6 = scalar_lea.hbm %s4373_s0, %s2968_s30  ;;  %s157_s7 = scalar_lea.vmem [#allocation2], %s2958_s29 }
  0x15   : > { %s167_s8 = sshll.u32 %s157_s7, 4  ;;  %p3867_p0 = pnand %p3583_p13, %p3833_p4  ;;  %s3863_s8 = int_to_ptr.vmem [resolvable:$true] %s167_s8 }
  0x16   : > { %s3872_s10 = scalar_lea.sflag [#allocation3], %s153_s28  ;;  %s3645_s11 = scalar_lea.hbm %s3861_s6, 2048 }
  0x17   : > { %p3646_p2 = scmp.ne.s32.totalorder %s3861_s6, %s3645_s11  ;;  %p3647_p3 = pneg %p3867_p0 }
  0x18   : > { %s3650_s21 = scalar_lea.hbm %s4373_s0, 4096  ;;  %p3651_p4 = scmp.lt.u32.totalorder %s3861_s6, %s4373_s0 }
  0x19   : > { %p3648_p5 = pnand %p3647_p3, %p3646_p2  ;;  %p3652_p7 = scmp.lt.u32.totalorder %s3650_s21, %s3645_s11 }
  0x1a   : > { %p3654_p13 = scmp.lt.u32.totalorder %s3645_s11, %s3861_s6 }
  0x1b   : > { %p3649_p6 = pneg %p3648_p5  ;;  %p3653_p10 = por %p3652_p7, %p3651_p4 }
  0x1d   : > { %p3655_p12 = por %p3654_p13, %p3653_p10 }
  0x1f   : > { %p3656_p1 = pnand %p3655_p12, %p3649_p6 }
  0x21   : > { %3659 = shalt.err (!%p3656_p1)
}
  0x22   : > { %s3660_s28 = scalar_lea.vmem %s3863_s8, 2048  ;;  %s3759_s29 = smov [#allocation2]  }
  0x23   : > { %p3661_p2 = scmp.ne.s32.totalorder %s3863_s8, %s3660_s28  ;;  %s3665_s30 = sshll.u32 %s3759_s29, 4  ;;  %s3666_s30 = int_to_ptr.vmem [resolvable:$false] %s3665_s30 }
  0x24   : > { %s3667_s4 = scalar_lea.vmem %s3666_s30, 4096  ;;  %p3668_p9 = scmp.lt.s32.totalorder %s3863_s8, %s3666_s30 }
  0x25   : > { %p3663_p5 = pnand %p3661_p2, %p3647_p3  ;;  %p3669_p4 = scmp.lt.s32.totalorder %s3667_s4, %s3660_s28 }
  0x27   : > { %p3664_p11 = pneg %p3663_p5  ;;  %p3670_p7 = por %p3669_p4, %p3668_p9 }
  0x29   : > { %p3671_p10 = pnand %p3670_p7, %p3664_p11 }
  0x2b   : > { %3674 = shalt.err (!%p3671_p10)
}
  0x2c   : > { %s3760_s5 = smov 128   ;;  %s3761_s7 = smov 8  }
  0x2d   : > { %3578 = dma.hbm_to_vmem [thread:$0]  (!%p3867_p0), %s3861_s6, 2048, %s3863_s8, %s3872_s10, %s3760_s5, %s3760_s5, %s3761_s7  }
  0x2e   : > { %p175_p12 = scmp.lt.s32.totalorder %s3757_s17, 3  ;;  %p4383_p1 = scmp.ge.s32.totalorder %s3757_s17, 1 }
  0x30   : > { %p176_p3 = pnand %p4383_p1, %p175_p12 }
  0x31   : > { %s3904_s11 = sand.u32 (!%p176_p3), 1, %s3741_s13  }
  0x32   : > { %179 = sbr.rel (%p176_p3) target bundleno = 1148 (0x47c), region = 32  ;;  %s2962_s18 = sshll.u32 (!%p176_p3), %s3904_s11, 7 }
  0x33   : > { %s182_s19 = scalar_lea.sflag (!%p176_p3), [#allocation3], %s3904_s11  ;;  %s3908_s21 = scalar_lea.vmem (!%p176_p3), [#allocation2], %s2962_s18 }
  0x39   : > { %3728 = dma.done.wait (%p3839_p8), %s182_s19, 2048  }
  0x3a   : > { %3730 = vsyncadd (%p3839_p8), %s182_s19, 4294965248  ;;  %vm227_vm0 = vcmask 130048   ;;  %v225_v0 = vld [vmem:[%s4374_s1] sm:$0xff]  ;;  %v226_v1 = vld [vmem:[%s4374_s1 + $0x8] sm:$0xff]  ;;  %s3764_s29 = smov 16   ;;  %s3765_s30 = smov 8  }
  0x3b   : > { %v209_v2 = vld [vmem:[%s3908_s21] sm:$0xff]  ;;  %v277_v3 = vand.u32 4294901760, %v225_v0  ;;  %v280_v4 = vand.u32 4294901760, %v226_v1  ;;  %v210_v13 = vld [vmem:[%s3908_s21 + $0x8] sm:$0xff]  ;;  %v211_v14 = vld [vmem:[%s3908_s21 + $0x10] sm:$0xff]  ;;  %s3766_s4 = smov 24  }
  0x3c   : > { %v229_v5 = vsel %vm227_vm0, %v209_v2, 0  ;;  %v212_v18 = vld [vmem:[%s3908_s21 + $0x18] sm:$0xff]  ;;  %v232_v19 = vsel %vm227_vm0, %v210_v13, 0  ;;  %v213_v20 = vld [vmem:[%s3908_s21 + $0x20] sm:$0xff]  ;;  %v235_v23 = vsel %vm227_vm0, %v211_v14, 0  ;;  %v214_v25 = vld [vmem:[%s3908_s21 + $0x28] sm:$0xff] }
  0x3d   : > { %v3922_v6 = vand.u32 4294901760, %v229_v5  ;;  %v3924_v7 = vsub.f32 %v225_v0, %v277_v3  ;;  %v3926_v8 = vsub.f32 %v226_v1, %v280_v4  ;;  %v3939_v15 = vpack.c.bf16 %v280_v4, %v277_v3  ;;  %v215_v26 = vld [vmem:[%s3908_s21 + $0x30] sm:$0xff]  ;;  %v216_v30 = vld [vmem:[%s3908_s21 + $0x38] sm:$0xff]  ;;  %v217_v36 = vld [vmem:[%s3908_s21 + $0x40] sm:$0xff]  ;;  %s3767_s5 = smov 48   ;;  %s3768_s7 = smov 32  }
  0x3e   : > { %v238_v24 = vsel %vm227_vm0, %v212_v18, 0  ;;  %v3955_v27 = vand.u32 4294901760, %v232_v19  ;;  %v241_v28 = vsel %vm227_vm0, %v213_v20, 0  ;;  %v3960_v29 = vand.u32 4294901760, %v235_v23  ;;  %v218_v46 = vld [vmem:[%s3908_s21 + $0x48] sm:$0xff]  ;;  %v219_v52 = vld [vmem:[%s3908_s21 + $0x50] sm:$0xff] }
  0x3f   : > { %3169 = vmatprep.mubr.f32.mxu0 %v3922_v6  ;;  %v506_v9 = vand.u32 4294901760, %v3924_v7  ;;  %v513_v10 = vand.u32 4294901760, %v3926_v8  ;;  %3402 = vmatprep.subr.bf16.mxu1 %v3939_v15  ;;  %v3409_v22 = vpack.c.bf16 %v3926_v8, %v3924_v7  ;;  %v3963_v31 = vand.u32 4294901760, %v238_v24  ;;  %v220_v0 = vld [vmem:[%s3908_s21 + $0x58] sm:$0xff]  ;;  %s3769_s18 = smov 40   ;;  %s3770_s19 = smov 56  }
  0x40   : > { %3404 = vmatpush3.bf16.msra.mxu1 %v3939_v15  ;;  %v244_v32 = vsel %vm227_vm0, %v214_v25, 0  ;;  %v247_v33 = vsel %vm227_vm0, %v215_v26, 0  ;;  %v3967_v34 = vand.u32 4294901760, %v241_v28  ;;  %v3970_v35 = vsub.f32 %v229_v5, %v3922_v6  ;;  %v221_v5 = vld [vmem:[%s3908_s21 + $0x60] sm:$0xff]  ;;  %s2965_s6 = sshll.u32 %s3749_s15, 7  ;;  %s2858_s15 = scalar_lea.sflag [#allocation4], %s3904_s11 }
  0x41   : > { %v507_v11 = vsub.f32 %v3924_v7, %v506_v9  ;;  %v514_v12 = vsub.f32 %v3926_v8, %v513_v10  ;;  %v3974_v37 = vsub.f32 %v232_v19, %v3955_v27  ;;  %v250_v38 = vsel %vm227_vm0, %v216_v30, 0  ;;  %s4324_s22 = scalar_lea.hbm %s4376_s3, %s2965_s6  ;;  %p4384_p9 = scmp.ne.s32.totalorder %s4380_s25, 0 }
  0x42   : > { %v3979_v39 = vsub.f32 %v235_v23, %v3960_v29  ;;  %v3982_v40 = vsub.f32 %v238_v24, %v3963_v31  ;;  %v3985_v41 = vand.u32 4294901760, %v244_v32  ;;  %v3987_v42 = vand.u32 4294901760, %v247_v33  ;;  %v223_v23 = vld [vmem:[%s3908_s21 + $0x70] sm:$0xff]  ;;  %s3771_s28 = smov [#allocation5]  }
  0x43   : > { %v508_v16 = vand.u32 4294901760, %v507_v11  ;;  %v515_v17 = vand.u32 4294901760, %v514_v12  ;;  %v3990_v43 = vsub.f32 %v241_v28, %v3967_v34  ;;  %v345_v44 = vand.u32 4294901760, %v3970_v35  ;;  %v222_v12 = vld [vmem:[%s3908_s21 + $0x68] sm:$0xff] }
  0x44   : > { %v253_v45 = vsel %vm227_vm0, %v217_v36, 0  ;;  %v355_v47 = vand.u32 4294901760, %v3974_v37  ;;  %v365_v48 = vand.u32 4294901760, %v3979_v39  ;;  %v375_v49 = vand.u32 4294901760, %v3982_v40 }
  0x45   : > { %v3945_v21 = vpack.c.bf16 %v515_v17, %v508_v16  ;;  %v3999_v50 = vand.u32 4294901760, %v250_v38  ;;  %v4002_v51 = vsub.f32 %v244_v32, %v3985_v41  ;;  %v385_v53 = vand.u32 4294901760, %v3990_v43 }
  0x46   : > { %v346_v54 = vsub.f32 %v3970_v35, %v345_v44  ;;  %v4011_v55 = vsub.f32 %v247_v33, %v3987_v42  ;;  %v356_v56 = vsub.f32 %v3974_v37, %v355_v47  ;;  %v366_v57 = vsub.f32 %v3979_v39, %v365_v48 }
  0x47   : > { %3406 = vmatprep.subr.bf16.mxu0 %v3945_v21  ;;  %3449 = vmatprep.subr.bf16.mxu1 %v3945_v21  ;;  %v376_v58 = vsub.f32 %v3982_v40, %v375_v49  ;;  %v4023_v59 = vand.u32 4294901760, %v253_v45  ;;  %v256_v60 = vsel %vm227_vm0, %v218_v46, 0  ;;  %v386_v62 = vsub.f32 %v3990_v43, %v385_v53 }
  0x48   : > { %3408 = vmatpush3.bf16.msra.mxu0 %v3945_v21  ;;  %v347_v61 = vand.u32 4294901760, %v346_v54  ;;  %v259_v63 = vsel %vm227_vm0, %v219_v52, 0  ;;  %v395_v1 = vand.u32 4294901760, %v4002_v51  ;;  %v357_v2 = vand.u32 4294901760, %v356_v56  ;;  %v224_v52 = vld [vmem:[%s3908_s21 + $0x78] sm:$0xff]  ;;  %s2963_s21 = sshll.u32 %s3904_s11, 3 }
  0x49   : > { %3410 = vmatprep.subr.bf16.mxu0 %v3409_v22  ;;  %v367_v3 = vand.u32 4294901760, %v366_v57  ;;  %v4033_v4 = vsub.f32 %v250_v38, %v3999_v50  ;;  %v4037_v11 = vand.u32 4294901760, %v256_v60  ;;  %v405_v13 = vand.u32 4294901760, %v4011_v55  ;;  %s207_s8 = scalar_lea.vmem [#allocation5], %s2963_s21 }
  0x4a   : > { %3141 = vmatprep.mubr.f32.mxu1 %v347_v61  ;;  %v377_v14 = vand.u32 4294901760, %v376_v58  ;;  %v396_v16 = vsub.f32 %v4002_v51, %v395_v1  ;;  %v4046_v17 = vsub.f32 %v253_v45, %v4023_v59  ;;  %v4048_v18 = vand.u32 4294901760, %v259_v63  ;;  %s2872_s9 = sshll.u32 %s207_s8, 4  ;;  %s4326_s9 = int_to_ptr.vmem [resolvable:$true] %s2872_s9 }
  0x4b   : > { %3170 = vmatmul.mubr.f32.vlgmr.msra.gmra.mrb[0].mxu0 %v3955_v27  ;;  %3142 = vmatmul.mubr.f32.vlgmr.msra.gmra.mrb[0].mxu1 %v357_v2  ;;  %v262_v19 = vsel %vm227_vm0, %v220_v0, 0  ;;  %v387_v20 = vand.u32 4294901760, %v386_v62  ;;  %v415_v24 = vand.u32 4294901760, %v4033_v4  ;;  %v406_v25 = vsub.f32 %v4011_v55, %v405_v13  ;;  %s3675_s23 = scalar_lea.vmem %s4326_s9, 128 }
  0x4c   : > { %3412 = vmatpush3.bf16.msra.mxu0 %v3409_v22  ;;  %3172 = vmatprep.mubr.f32.mxu0 %v3960_v29  ;;  %v265_v22 = vsel %vm227_vm0, %v221_v5, 0  ;;  %v268_v26 = vsel %vm227_vm0, %v222_v12, 0  ;;  %v425_v28 = vand.u32 4294901760, %v4046_v17  ;;  %v4062_v30 = vsub.f32 %v256_v60, %v4037_v11  ;;  %p3676_p8 = scmp.ne.s32.totalorder %s4326_s9, %s3675_s23 }
  0x4d   : > { %3414 = vmatprep.subr.bf16.mxu0 %v3939_v15  ;;  %3144 = vmatprep.mubr.f32.mxu1 %v367_v3  ;;  %v4064_v32 = vand.u32 4294901760, %v262_v19  ;;  %v397_v33 = vand.u32 4294901760, %v396_v16  ;;  %v416_v36 = vsub.f32 %v4033_v4, %v415_v24  ;;  %v4073_v38 = vand.u32 4294901760, %v265_v22 }
  0x4e   : > { %3450 = vmatpush3.bf16.msra.mxu1 %v3945_v21  ;;  %v4071_v21 = vsub.f32 %v259_v63, %v4048_v18  ;;  %v271_v45 = vsel %vm227_vm0, %v223_v23, 0  ;;  %v426_v46 = vsub.f32 %v4046_v17, %v425_v28  ;;  %v4084_v54 = vpack.c.bf16 %v513_v10, %v506_v9  ;;  %p3677_p11 = pnand %p3676_p8, %p4384_p9 }
  0x4f   : > { %3173 = vmatmul.mubr.f32.gmra.mrb[2].mxu0 %v3963_v31  ;;  %3145 = vmatmul.mubr.f32.gmra.mrb[2].mxu1 %v377_v14  ;;  %v435_v56 = vand.u32 4294901760, %v4062_v30  ;;  %v407_v57 = vand.u32 4294901760, %v406_v25  ;;  %v4087_v58 = vand.u32 4294901760, %v268_v26  ;;  %v4092_v61 = vsub.f32 %v262_v19, %v4064_v32 }
  0x50   : > { %3175 = vmatprep.mubr.f32.mxu0 %v3967_v34  ;;  %3147 = vmatprep.mubr.f32.mxu1 %v387_v20  ;;  %v445_v60 = vand.u32 4294901760, %v4071_v21  ;;  %v4094_v62 = vand.u32 4294901760, %v271_v45  ;;  %v417_v7 = vand.u32 4294901760, %v416_v36  ;;  %v4102_v9 = vsub.f32 %v265_v22, %v4073_v38  ;;  %p3678_p0 = pneg %p3677_p11 }
  0x51   : > { %v436_v8 = vsub.f32 %v4062_v30, %v435_v56  ;;  %v274_v10 = vsel %vm227_vm0, %v224_v52, 0  ;;  %v427_v63 = vand.u32 4294901760, %v426_v46  ;;  %v455_v2 = vand.u32 4294901760, %v4092_v61 }
  0x52   : > { %v446_v0 = vsub.f32 %v4071_v21, %v445_v60  ;;  %v465_v3 = vand.u32 4294901760, %v4102_v9  ;;  %v4113_v5 = vsub.f32 %v268_v26, %v4087_v58  ;;  %v4115_v12 = vand.u32 4294901760, %v274_v10 }
  0x53   : > { %3176 = vmatmul.mubr.f32.gmra.mrb[4].mxu0 %v3985_v41  ;;  %3148 = vmatmul.mubr.f32.gmra.mrb[4].mxu1 %v397_v33  ;;  %v437_v14 = vand.u32 4294901760, %v436_v8  ;;  %v456_v16 = vsub.f32 %v4092_v61, %v455_v2  ;;  %v484_v19 = vsub.f32 %v271_v45, %v4094_v62  ;;  %vm2842_vm1 = vcmask 64512  }
  0x54   : > { %3178 = vmatprep.mubr.f32.mxu0 %v3987_v42  ;;  %3150 = vmatprep.mubr.f32.mxu1 %v407_v57  ;;  %v447_v20 = vand.u32 4294901760, %v446_v0  ;;  %v466_v22 = vsub.f32 %v4102_v9, %v465_v3  ;;  %v475_v23 = vand.u32 4294901760, %v4113_v5  ;;  %v494_v26 = vsub.f32 %v274_v10, %v4115_v12 }
  0x55   : > { %v485_v25 = vand.u32 4294901760, %v484_v19  ;;  %v457_v33 = vand.u32 4294901760, %v456_v16  ;;  %vm2845_vm2 = vcmask 195584   ;;  %vm2847_vm3 = vcmask 261120  }
  0x56   : > { %v476_v36 = vsub.f32 %v4113_v5, %v475_v23  ;;  %v467_v45 = vand.u32 4294901760, %v466_v22  ;;  %v495_v52 = vand.u32 4294901760, %v494_v26  ;;  %vm2849_vm4 = vcmask 326656  }
  0x57   : > { %3179 = vmatmul.mubr.f32.gmra.mrb[6].mxu0 %v3999_v50  ;;  %3151 = vmatmul.mubr.f32.gmra.mrb[6].mxu1 %v417_v7  ;;  %v486_v46 = vsub.f32 %v484_v19, %v485_v25  ;;  %vm2851_vm5 = vcmask 392192   ;;  %vm2853_vm6 = vcmask 457728   ;;  %vm2855_vm7 = vcmask 523264  }
  0x58   : > { %3197 = vmatprep.mubr.f32.mxu0 %v3970_v35  ;;  %3153 = vmatprep.mubr.f32.mxu1 %v427_v63  ;;  %v477_v57 = vand.u32 4294901760, %v476_v36  ;;  %v496_v7 = vsub.f32 %v494_v26, %v495_v52 }
  0x59   : > { %v487_v8 = vand.u32 4294901760, %v486_v46 }
  0x5a   : > { %v497_v10 = vand.u32 4294901760, %v496_v7 }
  0x5b   : > { %3198 = vmatmul.mubr.f32.vlgmr.msra.gmra.mrb[0].mxu0 %v3974_v37  ;;  %3154 = vmatmul.mubr.f32.gmra.mrb[8].mxu1 %v437_v14  ;;  %v4209_v37 = vld [vmem:[%s4375_s2] sm:$0xff] }
  0x5c   : > { %3416 = vmatpush3.bf16.msra.mxu0 %v3939_v15  ;;  %3200 = vmatprep.mubr.f32.mxu0 %v3979_v39  ;;  %v4214_v39 = vld [vmem:[%s4375_s2 + $0x8] sm:$0xff] }
  0x5d   : > { %3418 = vmatprep.subr.bf16.mxu0 %v4084_v54  ;;  %3156 = vmatprep.mubr.f32.mxu1 %v447_v20 }
  0x5f   : > { %3201 = vmatmul.mubr.f32.gmra.mrb[2].mxu0 %v3982_v40  ;;  %3157 = vmatmul.mubr.f32.gmra.mrb[10].mxu1 %v457_v33 }
  0x60   : > { %3203 = vmatprep.mubr.f32.mxu0 %v3990_v43  ;;  %3159 = vmatprep.mubr.f32.mxu1 %v467_v45 }
  0x63   : > { %3204 = vmatmul.mubr.f32.gmra.mrb[4].mxu0 %v4002_v51  ;;  %3160 = vmatmul.mubr.f32.gmra.mrb[12].mxu1 %v477_v57 }
  0x64   : > { %3206 = vmatprep.mubr.f32.mxu0 %v4011_v55  ;;  %3162 = vmatprep.mubr.f32.mxu1 %v487_v8 }
  0x67   : > { %3207 = vmatmul.mubr.f32.gmra.mrb[6].mxu0 %v4033_v4  ;;  %3163 = vmatmul.mubr.f32.gmra.mrb[14].mxu1 %v497_v10 }
  0x68   : > { %3209 = vmatprep.mubr.f32.mxu0 %v4046_v17  ;;  %3181 = vmatprep.mubr.f32.mxu1 %v4023_v59 }
  0x6b   : > { %3210 = vmatmul.mubr.f32.gmra.mrb[8].mxu0 %v4062_v30  ;;  %3182 = vmatmul.mubr.f32.vlgmr.msra.gmra.mrb[8].mxu1 %v4037_v11 }
  0x6c   : > { %3212 = vmatprep.mubr.f32.mxu0 %v4071_v21  ;;  %3184 = vmatprep.mubr.f32.mxu1 %v4048_v18 }
  0x6f   : > { %3213 = vmatmul.mubr.f32.gmra.mrb[10].mxu0 %v4092_v61  ;;  %3185 = vmatmul.mubr.f32.gmra.mrb[10].mxu1 %v4064_v32 }
  0x70   : > { %3215 = vmatprep.mubr.f32.mxu0 %v4102_v9  ;;  %3187 = vmatprep.mubr.f32.mxu1 %v4073_v38 }
  0x73   : > { %3216 = vmatmul.mubr.f32.gmra.mrb[12].mxu0 %v4113_v5  ;;  %3188 = vmatmul.mubr.f32.gmra.mrb[12].mxu1 %v4087_v58 }
  0x74   : > { %3218 = vmatprep.mubr.f32.mxu0 %v484_v19  ;;  %3190 = vmatprep.mubr.f32.mxu1 %v4094_v62 }
  0x77   : > { %3219 = vmatmul.mubr.f32.gmra.mrb[14].mxu0 %v494_v26  ;;  %3191 = vmatmul.mubr.f32.gmra.mrb[14].mxu1 %v4115_v12 }
  0x78   : > { %3225 = vmatprep.mubr.f32.mxu0 %v345_v44 }
  0x7b   : > { %3226 = vmatmul.mubr.f32.vlgmr.msra.gmra.mrb[0].mxu0 %v355_v47 }
  0x7c   : > { %3420 = vmatpush3.bf16.msra.mxu0 %v4084_v54  ;;  %3228 = vmatprep.mubr.f32.mxu0 %v365_v48 }
  0x7d   : > { %3422 = vmatprep.subr.bf16.mxu0 %v3939_v15 }
  0x7f   : > { %3229 = vmatmul.mubr.f32.gmra.mrb[2].mxu0 %v375_v49 }
  0x80   : > { %3231 = vmatprep.mubr.f32.mxu0 %v385_v53 }
  0x83   : > { %3232 = vmatmul.mubr.f32.gmra.mrb[4].mxu0 %v395_v1 }
  0x84   : > { %3234 = vmatprep.mubr.f32.mxu0 %v405_v13 }
  0x87   : > { %3235 = vmatmul.mubr.f32.gmra.mrb[6].mxu0 %v415_v24 }
  0x88   : > { %3237 = vmatprep.mubr.f32.mxu0 %v425_v28 }
  0x8b   : > { %3238 = vmatmul.mubr.f32.gmra.mrb[8].mxu0 %v435_v56 }
  0x8c   : > { %3240 = vmatprep.mubr.f32.mxu0 %v445_v60 }
  0x8f   : > { %3241 = vmatmul.mubr.f32.gmra.mrb[10].mxu0 %v455_v2 }
  0x90   : > { %3243 = vmatprep.mubr.f32.mxu0 %v465_v3 }
  0x93   : > { %3244 = vmatmul.mubr.f32.gmra.mrb[12].mxu0 %v475_v23 }
  0x94   : > { %3246 = vmatprep.mubr.f32.mxu0 %v485_v25 }
  0x97   : > { %3247 = vmatmul.mubr.f32.gmra.mrb[14].mxu0 %v495_v52 }
  0x98   : > { %3253 = vmatprep.mubr.f32.mxu0 %v3922_v6 }
  0x9b   : > { %3254 = vmatmul.mubr.f32.vlgmr.msra.gmra.mrb[0].mxu0 %v3955_v27 }
  0x9c   : > { %3424 = vmatpush3.bf16.msra.mxu0 %v3939_v15  ;;  %3256 = vmatprep.mubr.f32.mxu0 %v3960_v29 }
  0x9f   : > { %3257 = vmatmul.mubr.f32.gmra.mrb[2].mxu0 %v3963_v31 }
  0xa0   : > { %3259 = vmatprep.mubr.f32.mxu0 %v3967_v34 }
  0xa3   : > { %3260 = vmatmul.mubr.f32.gmra.mrb[4].mxu0 %v3985_v41 }
  0xa4   : > { %3262 = vmatprep.mubr.f32.mxu0 %v3987_v42 }
  0xa7   : > { %3263 = vmatmul.mubr.f32.gmra.mrb[6].mxu0 %v3999_v50 }
  0xa8   : > { %3265 = vmatprep.mubr.f32.mxu0 %v4023_v59 }
  0xab   : > { %3266 = vmatmul.mubr.f32.gmra.mrb[8].mxu0 %v4037_v11 }
  0xac   : > { %3268 = vmatprep.mubr.f32.mxu0 %v4048_v18 }
  0xaf   : > { %3269 = vmatmul.mubr.f32.gmra.mrb[10].mxu0 %v4064_v32 }
  0xb0   : > { %3271 = vmatprep.mubr.f32.mxu0 %v4073_v38 }
  0xb3   : > { %3272 = vmatmul.mubr.f32.gmra.mrb[12].mxu0 %v4087_v58 }
  0xb4   : > { %3274 = vmatprep.mubr.f32.mxu0 %v4094_v62 }
  0xb7   : > { %3275 = vmatmul.mubr.f32.gmra.mrb[14].mxu0 %v4115_v12 }
  0xb8   : > { %3281 = vmatprep.mubr.f32.mxu0 %v3922_v6 }
  0xbb   : > { %3282 = vmatmul.mubr.f32.vlgmr.msra.gmra.mrb[0].mxu0 %v3955_v27 }
  0xbc   : > { %3284 = vmatprep.mubr.f32.mxu0 %v3960_v29 }
  0xbf   : > { %3285 = vmatmul.mubr.f32.gmra.mrb[2].mxu0 %v3963_v31 }
  0xc0   : > { %3287 = vmatprep.mubr.f32.mxu0 %v3967_v34 }
  0xc3   : > { %3288 = vmatmul.mubr.f32.gmra.mrb[4].mxu0 %v3985_v41  ;;  %v1663_v41 = vand.u32 4294901760, %v4209_v37 }
  0xc4   : > { %3290 = vmatprep.mubr.f32.mxu0 %v3987_v42  ;;  %v1666_v42 = vand.u32 4294901760, %v4214_v39 }
  0xc5   : > { %v1811_v25 = vsub.f32 %v4209_v37, %v1663_v41 }
  0xc6   : > { %v4218_v43 = vpack.c.bf16 %v1666_v42, %v1663_v41  ;;  %v1818_v26 = vsub.f32 %v4214_v39, %v1666_v42 }
  0xc7   : > { %3291 = vmatmul.mubr.f32.gmra.mrb[6].mxu0 %v3999_v50  ;;  %v1812_v33 = vand.u32 4294901760, %v1811_v25 }
  0xc8   : > { %3293 = vmatprep.mubr.f32.mxu0 %v4023_v59  ;;  %3426 = vmatprep.subr.bf16.mxu1 %v4218_v43  ;;  %v1819_v36 = vand.u32 4294901760, %v1818_v26  ;;  %v4224_v8 = vpack.c.bf16 %v1818_v26, %v1811_v25 }
  0xc9   : > { %3428 = vmatpush3.bf16.msra.mxu1 %v4218_v43  ;;  %v1813_v45 = vsub.f32 %v1811_v25, %v1812_v33 }
  0xca   : > { %v1820_v46 = vsub.f32 %v1818_v26, %v1819_v36  ;;  %v4226_v10 = vpack.c.bf16 %v1819_v36, %v1812_v33 }
  0xcb   : > { %3294 = vmatmul.mubr.f32.gmra.mrb[8].mxu0 %v4037_v11  ;;  %v1814_v52 = vand.u32 4294901760, %v1813_v45 }
  0xcc   : > { %3296 = vmatprep.mubr.f32.mxu0 %v4048_v18  ;;  %v1821_v57 = vand.u32 4294901760, %v1820_v46 }
  0xce   : > { %v3429_v7 = vpack.c.bf16 %v1821_v57, %v1814_v52 }
  0xcf   : > { %3297 = vmatmul.mubr.f32.gmra.mrb[10].mxu0 %v4064_v32 }
  0xd0   : > { %3299 = vmatprep.mubr.f32.mxu0 %v4073_v38  ;;  %3430 = vmatprep.subr.bf16.mxu1 %v3429_v7 }
  0xd3   : > { %3300 = vmatmul.mubr.f32.gmra.mrb[12].mxu0 %v4087_v58 }
  0xd4   : > { %3302 = vmatprep.mubr.f32.mxu0 %v4094_v62 }
  0xd7   : > { %3303 = vmatmul.mubr.f32.gmra.mrb[14].mxu0 %v4115_v12 }
 0x11e   : > { %v3143_v6 = vpop.f32.mrb[0].mxu1 }
 0x11f   : > { %v349_v15 = vpop.f32.mrb[1].mxu1 }
 0x122   : > { %v3146_v27 = vpop.f32.mrb[2].mxu1 }
 0x123   : > { %v369_v29 = vpop.f32.mrb[3].mxu1 }
 0x126   : > { %v3149_v31 = vpop.f32.mrb[4].mxu1 }
 0x127   : > { %v389_v34 = vpop.f32.mrb[5].mxu1 }
 0x12a   : > { %v3152_v35 = vpop.f32.mrb[6].mxu1 }
 0x12b   : > { %v409_v40 = vpop.f32.mrb[7].mxu1 }
 0x13e   : > { %v3183_v44 = vpop.f32.mrb[8].mxu1 }
 0x13f   : > { %v628_v47 = vpop.f32.mrb[9].mxu1 }
 0x142   : > { %v3186_v48 = vpop.f32.mrb[10].mxu1 }
 0x143   : > { %v640_v49 = vpop.f32.mrb[11].mxu1 }
 0x146   : > { %v3189_v50 = vpop.f32.mrb[12].mxu1 }
 0x147   : > { %v652_v51 = vpop.f32.mrb[13].mxu1 }
 0x14a   : > { %v3192_v53 = vpop.f32.mrb[14].mxu1 }
 0x14b   : > { %v664_v55 = vpop.f32.mrb[15].mxu1 }
 0x18e   : > { %v3283_v59 = vpop.f32.mrb[0].mxu0 }
 0x18f   : > { %v3451_v1 = vadd.f32 %v3283_v59, %v3143_v6  ;;  %v1286_v4 = vpop.f32.mrb[1].mxu0 }
 0x190   : > { %v3452_v11 = vadd.f32 %v1286_v4, %v349_v15 }
 0x192   : > { %v3286_v13 = vpop.f32.mrb[2].mxu0  ;;  %1380 = vxpose.xlu0.b32.start [1/2] (short) (narrow) %v3452_v11, 8 }
 0x193   : > { %v3453_v17 = vadd.f32 %v3286_v13, %v3146_v27  ;;  %v1298_v18 = vpop.f32.mrb[3].mxu0 }
 0x194   : > { %v3454_v24 = vadd.f32 %v1298_v18, %v369_v29 }
 0x196   : > { %v3289_v28 = vpop.f32.mrb[4].mxu0  ;;  %1381 = vxpose.xlu0.b32.end [2/2] (short) (narrow) %v3451_v1, 8  ;;  %1412 = vxpose.xlu1.b32.start [1/2] (short) (narrow) %v3454_v24, 8 }
 0x197   : > { %v3455_v30 = vadd.f32 %v3289_v28, %v3149_v31  ;;  %v1310_v32 = vpop.f32.mrb[5].mxu0 }
 0x198   : > { %v3456_v21 = vadd.f32 %v1310_v32, %v389_v34 }
 0x19a   : > { %v3292_v38 = vpop.f32.mrb[6].mxu0  ;;  %1413 = vxpose.xlu1.b32.end [2/2] (short) (narrow) %v3453_v17, 8  ;;  %1444 = vxpose.xlu0.b32.start [1/2] (short) (narrow) %v3456_v21, 8 }
 0x19b   : > { %v3457_v54 = vadd.f32 %v3292_v38, %v3152_v35  ;;  %v1322_v56 = vpop.f32.mrb[7].mxu0 }
 0x19c   : > { %v3458_v58 = vadd.f32 %v1322_v56, %v409_v40 }
 0x19e   : > { %v3295_v60 = vpop.f32.mrb[8].mxu0  ;;  %1445 = vxpose.xlu0.b32.end [2/2] (short) (narrow) %v3455_v30, 8  ;;  %1476 = vxpose.xlu1.b32.start [1/2] (short) (narrow) %v3458_v58, 8 }
 0x19f   : > { %v3459_v61 = vadd.f32 %v3295_v60, %v3183_v44  ;;  %v1334_v62 = vpop.f32.mrb[9].mxu0 }
 0x1a0   : > { %v3460_v9 = vadd.f32 %v1334_v62, %v628_v47 }
 0x1a2   : > { %v3298_v63 = vpop.f32.mrb[10].mxu0  ;;  %1477 = vxpose.xlu1.b32.end [2/2] (short) (narrow) %v3457_v54, 8  ;;  %1508 = vxpose.xlu0.b32.start [1/2] (short) (narrow) %v3460_v9, 8 }
 0x1a3   : > { %v3461_v0 = vadd.f32 %v3298_v63, %v3186_v48  ;;  %v1346_v2 = vpop.f32.mrb[11].mxu0 }
 0x1a4   : > { %v3462_v3 = vadd.f32 %v1346_v2, %v640_v49 }
 0x1a6   : > { %v3301_v5 = vpop.f32.mrb[12].mxu0  ;;  %1509 = vxpose.xlu0.b32.end [2/2] (short) (narrow) %v3459_v61, 8  ;;  %1540 = vxpose.xlu1.b32.start [1/2] (short) (narrow) %v3462_v3, 8 }
 0x1a7   : > { %v3463_v12 = vadd.f32 %v3301_v5, %v3189_v50  ;;  %v1358_v14 = vpop.f32.mrb[13].mxu0 }
 0x1a8   : > { %v3464_v16 = vadd.f32 %v1358_v14, %v652_v51 }
 0x1aa   : > { %v3304_v19 = vpop.f32.mrb[14].mxu0  ;;  %1541 = vxpose.xlu1.b32.end [2/2] (short) (narrow) %v3461_v0, 8  ;;  %1572 = vxpose.xlu0.b32.start [1/2] (short) (narrow) %v3464_v16, 8 }
 0x1ab   : > { %v3465_v20 = vadd.f32 %v3304_v19, %v3192_v53  ;;  %v1370_v22 = vpop.f32.mrb[15].mxu0 }
 0x1ac   : > { %v3466_v23 = vadd.f32 %v1370_v22, %v664_v55 }
 0x1ae   : > { %1573 = vxpose.xlu0.b32.end [2/2] (short) (narrow) %v3463_v12, 8  ;;  %1604 = vxpose.xlu1.b32.start [1/2] (short) (narrow) %v3466_v23, 8 }
 0x1b2   : > { %1605 = vxpose.xlu1.b32.end [2/2] (short) (narrow) %v3465_v20, 8 }
 0x212   : > { %v1396_v6 = vpop.trf.xlu0 }
 0x213   : > { %v1639_v15 = vsel %vm227_vm0, %v1396_v6, 0 }
 0x214   : > { %v4229_v27 = vand.u32 4294901760, %v1639_v15 }
 0x216   : > { %v4232_v29 = vsub.f32 %v1639_v15, %v4229_v27  ;;  %v1428_v31 = vpop.trf.xlu1  ;;  %v3762_v15 = vmov 1983009808  }
 0x217   : > { %v1642_v34 = vsel %vm227_vm0, %v1428_v31, 0 }
 0x218   : > { %v1731_v35 = vand.u32 4294901760, %v4232_v29  ;;  %v4236_v37 = vand.u32 4294901760, %v1642_v34 }
 0x21a   : > { %v4239_v39 = vsub.f32 %v1642_v34, %v4236_v37  ;;  %v1460_v40 = vpop.trf.xlu0  ;;  %v1732_v41 = vsub.f32 %v4232_v29, %v1731_v35 }
 0x21b   : > { %v1645_v42 = vsel %vm227_vm0, %v1460_v40, 0  ;;  %v3763_v40 = vmov 1934713408  }
 0x21c   : > { %v1741_v44 = vand.u32 4294901760, %v4239_v39  ;;  %v4246_v47 = vand.u32 4294901760, %v1645_v42  ;;  %v1733_v48 = vand.u32 4294901760, %v1732_v41  ;;  %v2745_v41 = vunpack.c.l.s4 %v3763_v40 }
 0x21e   : > { %v1742_v49 = vsub.f32 %v4239_v39, %v1741_v44  ;;  %v4252_v50 = vsub.f32 %v1645_v42, %v4246_v47  ;;  %v1492_v51 = vpop.trf.xlu1  ;;  %3309 = vmatprep.mubr.f32.mxu1 %v1733_v48 }
 0x21f   : > { %v1648_v53 = vsel %vm227_vm0, %v1492_v51, 0 }
 0x220   : > { %v1743_v55 = vand.u32 4294901760, %v1742_v49  ;;  %v1751_v59 = vand.u32 4294901760, %v4252_v50  ;;  %v4256_v1 = vand.u32 4294901760, %v1648_v53 }
 0x222   : > { %v4259_v4 = vsub.f32 %v1648_v53, %v4256_v1  ;;  %v1524_v11 = vpop.trf.xlu0  ;;  %3310 = vmatmul.mubr.f32.vlgmr.msra.gmra.mrb[16].mxu1 %v1743_v55  ;;  %v1752_v13 = vsub.f32 %v4252_v50, %v1751_v59 }
 0x223   : > { %v1651_v17 = vsel %vm227_vm0, %v1524_v11, 0  ;;  %3432 = vmatpush3.bf16.msra.mxu1 %v3429_v7 }
 0x224   : > { %v1761_v18 = vand.u32 4294901760, %v4259_v4  ;;  %v4266_v24 = vand.u32 4294901760, %v1651_v17  ;;  %v1753_v28 = vand.u32 4294901760, %v1752_v13  ;;  %3434 = vmatprep.subr.bf16.mxu1 %v4224_v8 }
 0x226   : > { %v1770_v30 = vsub.f32 %v1651_v17, %v4266_v24  ;;  %v1556_v32 = vpop.trf.xlu1  ;;  %3312 = vmatprep.mubr.f32.mxu1 %v1753_v28  ;;  %v1762_v21 = vsub.f32 %v4259_v4, %v1761_v18 }
 0x227   : > { %v1654_v38 = vsel %vm227_vm0, %v1556_v32, 0 }
 0x228   : > { %v1771_v54 = vand.u32 4294901760, %v1770_v30  ;;  %v4272_v56 = vand.u32 4294901760, %v1654_v38  ;;  %v1763_v58 = vand.u32 4294901760, %v1762_v21 }
 0x22a   : > { %v1780_v60 = vsub.f32 %v1654_v38, %v4272_v56  ;;  %v1588_v61 = vpop.trf.xlu0  ;;  %3313 = vmatmul.mubr.f32.gmra.mrb[18].mxu1 %v1763_v58  ;;  %v1772_v62 = vsub.f32 %v1770_v30, %v1771_v54 }
 0x22b   : > { %v1657_v9 = vsel %vm227_vm0, %v1588_v61, 0 }
 0x22c   : > { %v1781_v63 = vand.u32 4294901760, %v1780_v60  ;;  %v4276_v0 = vand.u32 4294901760, %v1657_v9  ;;  %v1773_v2 = vand.u32 4294901760, %v1772_v62 }
 0x22e   : > { %v1790_v3 = vsub.f32 %v1657_v9, %v4276_v0  ;;  %v1620_v5 = vpop.trf.xlu1  ;;  %3315 = vmatprep.mubr.f32.mxu1 %v1773_v2  ;;  %v1782_v12 = vsub.f32 %v1780_v60, %v1781_v63 }
 0x22f   : > { %v1660_v14 = vsel %vm227_vm0, %v1620_v5, 0 }
 0x230   : > { %v1791_v16 = vand.u32 4294901760, %v1790_v3  ;;  %v1799_v19 = vand.u32 4294901760, %v1660_v14  ;;  %v1783_v20 = vand.u32 4294901760, %v1782_v12 }
 0x232   : > { %v1800_v22 = vsub.f32 %v1660_v14, %v1799_v19  ;;  %3316 = vmatmul.mubr.f32.gmra.mrb[20].mxu1 %v1783_v20  ;;  %v1792_v23 = vsub.f32 %v1790_v3, %v1791_v16 }
 0x234   : > { %v1801_v25 = vand.u32 4294901760, %v1800_v22  ;;  %v1793_v26 = vand.u32 4294901760, %v1792_v23 }
 0x236   : > { %3318 = vmatprep.mubr.f32.mxu1 %v1793_v26  ;;  %v1802_v33 = vsub.f32 %v1800_v22, %v1801_v25 }
 0x238   : > { %v1803_v36 = vand.u32 4294901760, %v1802_v33 }
 0x23a   : > { %3319 = vmatmul.mubr.f32.gmra.mrb[22].mxu1 %v1803_v36 }
 0x23b   : > { %3325 = vmatprep.mubr.f32.mxu1 %v4229_v27 }
 0x23e   : > { %3326 = vmatmul.mubr.f32.vlgmr.msra.gmra.mrb[16].mxu1 %v4236_v37 }
 0x23f   : > { %3328 = vmatprep.mubr.f32.mxu1 %v4246_v47  ;;  %3436 = vmatpush3.bf16.msra.mxu1 %v4224_v8 }
 0x240   : > { %3438 = vmatprep.subr.bf16.mxu1 %v4218_v43 }
 0x242   : > { %3329 = vmatmul.mubr.f32.gmra.mrb[18].mxu1 %v4256_v1 }
 0x243   : > { %3331 = vmatprep.mubr.f32.mxu1 %v4266_v24 }
 0x246   : > { %3332 = vmatmul.mubr.f32.gmra.mrb[20].mxu1 %v4272_v56 }
 0x247   : > { %3334 = vmatprep.mubr.f32.mxu1 %v4276_v0 }
 0x24a   : > { %3335 = vmatmul.mubr.f32.gmra.mrb[22].mxu1 %v1799_v19 }
 0x24b   : > { %3341 = vmatprep.mubr.f32.mxu1 %v4232_v29  ;;  %v2683_v29 = vlaneseq }
 0x24e   : > { %3342 = vmatmul.mubr.f32.vlgmr.msra.gmra.mrb[16].mxu1 %v4239_v39 }
 0x24f   : > { %3344 = vmatprep.mubr.f32.mxu1 %v4252_v50  ;;  %3440 = vmatpush3.bf16.msra.mxu1 %v4218_v43  ;;  %v2746_v50 = vunpack.c.0.s8 %v2745_v41 }
 0x250   : > { %3442 = vmatprep.subr.bf16.mxu1 %v4226_v10 }
 0x252   : > { %3345 = vmatmul.mubr.f32.gmra.mrb[18].mxu1 %v4259_v4 }
 0x253   : > { %3347 = vmatprep.mubr.f32.mxu1 %v1770_v30 }
 0x256   : > { %3348 = vmatmul.mubr.f32.gmra.mrb[20].mxu1 %v1780_v60 }
 0x257   : > { %3350 = vmatprep.mubr.f32.mxu1 %v1790_v3 }
 0x25a   : > { %3351 = vmatmul.mubr.f32.gmra.mrb[22].mxu1 %v1800_v22 }
 0x25b   : > { %3357 = vmatprep.mubr.f32.mxu1 %v1731_v35  ;;  %v2684_v35 = vshrl.u32 %v2683_v29, 7 }
 0x25e   : > { %3358 = vmatmul.mubr.f32.vlgmr.msra.gmra.mrb[16].mxu1 %v1741_v44 }
 0x25f   : > { %3360 = vmatprep.mubr.f32.mxu1 %v1751_v59  ;;  %3444 = vmatpush3.bf16.msra.mxu1 %v4226_v10 }
 0x260   : > { %3446 = vmatprep.subr.bf16.mxu1 %v4218_v43 }
 0x262   : > { %3361 = vmatmul.mubr.f32.gmra.mrb[18].mxu1 %v1761_v18 }
 0x263   : > { %3363 = vmatprep.mubr.f32.mxu1 %v1771_v54 }
 0x266   : > { %3364 = vmatmul.mubr.f32.gmra.mrb[20].mxu1 %v1781_v63 }
 0x267   : > { %3366 = vmatprep.mubr.f32.mxu1 %v1791_v16 }
 0x26a   : > { %3367 = vmatmul.mubr.f32.gmra.mrb[22].mxu1 %v1801_v25 }
 0x26b   : > { %3373 = vmatprep.mubr.f32.mxu1 %v4229_v27 }
 0x26e   : > { %3374 = vmatmul.mubr.f32.vlgmr.msra.gmra.mrb[16].mxu1 %v4236_v37 }
 0x26f   : > { %3376 = vmatprep.mubr.f32.mxu1 %v4246_v47  ;;  %3448 = vmatpush3.bf16.msra.mxu1 %v4218_v43 }
 0x272   : > { %3377 = vmatmul.mubr.f32.gmra.mrb[18].mxu1 %v4256_v1 }
 0x273   : > { %3379 = vmatprep.mubr.f32.mxu1 %v4266_v24 }
 0x276   : > { %3380 = vmatmul.mubr.f32.gmra.mrb[20].mxu1 %v4272_v56 }
 0x277   : > { %3382 = vmatprep.mubr.f32.mxu1 %v4276_v0 }
 0x27a   : > { %3383 = vmatmul.mubr.f32.gmra.mrb[22].mxu1 %v1799_v19 }
 0x27b   : > { %3389 = vmatprep.mubr.f32.mxu1 %v4229_v27  ;;  %v2681_v27 = vunpack.c.l.s4 %v3762_v15 }
 0x27d   : > { %v2682_v34 = vunpack.c.0.s8 %v2681_v27 }
 0x27e   : > { %3390 = vmatmul.mubr.f32.vlgmr.msra.gmra.mrb[16].mxu1 %v4236_v37 }
 0x27f   : > { %3392 = vmatprep.mubr.f32.mxu1 %v4246_v47  ;;  %v2685_v42 = vsub.s32 %v2682_v34, %v2684_v35 }
 0x282   : > { %3393 = vmatmul.mubr.f32.gmra.mrb[18].mxu1 %v4256_v1 }
 0x283   : > { %3395 = vmatprep.mubr.f32.mxu1 %v4266_v24  ;;  %v2749_v24 = vsub.s32 %v2746_v50, %v2684_v35 }
 0x286   : > { %3396 = vmatmul.mubr.f32.gmra.mrb[20].mxu1 %v4272_v56 }
 0x287   : > { %3398 = vmatprep.mubr.f32.mxu1 %v4276_v0 }
 0x28a   : > { %3399 = vmatmul.mubr.f32.gmra.mrb[22].mxu1 %v1799_v19 }
 0x351   : > { %v3391_v43 = vpop.f32.mrb[16].mxu1 }
 0x352   : > { %2454 = vxpose.xlu1.b32.start.end [1/1] (short) (narrow) %v3391_v43, 8  ;;  %v2376_v45 = vpop.f32.mrb[17].mxu1 }
 0x353   : > { %2422 = vxpose.xlu0.b32.start.end [1/1] (short) (narrow) %v2376_v45, 8 }
 0x355   : > { %v3394_v46 = vpop.f32.mrb[18].mxu1 }
 0x356   : > { %2518 = vxpose.xlu1.b32.start.end [1/1] (short) (narrow) %v3394_v46, 8  ;;  %v2388_v52 = vpop.f32.mrb[19].mxu1 }
 0x357   : > { %2486 = vxpose.xlu0.b32.start.end [1/1] (short) (narrow) %v2388_v52, 8 }
 0x359   : > { %v3397_v57 = vpop.f32.mrb[20].mxu1 }
 0x35a   : > { %2582 = vxpose.xlu1.b32.start.end [1/1] (short) (narrow) %v3397_v57, 8  ;;  %v2400_v7 = vpop.f32.mrb[21].mxu1 }
 0x35b   : > { %2550 = vxpose.xlu0.b32.start.end [1/1] (short) (narrow) %v2400_v7, 8 }
 0x35d   : > { %v3400_v8 = vpop.f32.mrb[22].mxu1 }
 0x35e   : > { %2646 = vxpose.xlu1.b32.start.end [1/1] (short) (narrow) %v3400_v8, 8  ;;  %v2412_v10 = vpop.f32.mrb[23].mxu1 }
 0x35f   : > { %2614 = vxpose.xlu0.b32.start.end [1/1] (short) (narrow) %v2412_v10, 8 }
 0x3d2   : > { %v2470_v6 = vpop.trf.xlu1 }
 0x3d3   : > { %v2438_v31 = vpop.trf.xlu0 }
 0x3d6   : > { %v2534_v37 = vpop.trf.xlu1 }
 0x3d7   : > { %v2502_v39 = vpop.trf.xlu0  ;;  %v2694_v44 = vcombine.low %v2470_v6, %v2534_v37  ;;  %v2695_v51 = vcombine.high %v2470_v6, %v2534_v37 }
 0x3d8   : > { %v2678_v47 = vcombine.low %v2438_v31, %v2502_v39  ;;  %v2679_v53 = vcombine.high %v2438_v31, %v2502_v39 }
 0x3d9   : > { %v2702_v55 = vrot.slane %v2694_v44, %v2685_v42  ;;  %v2709_v28 = vrot.slane %v2695_v51, %v2685_v42 }
 0x3da   : > { %v2598_v48 = vpop.trf.xlu1  ;;  %v2686_v59 = vrot.slane %v2678_v47, %v2685_v42  ;;  %v2693_v30 = vrot.slane %v2679_v53, %v2685_v42 }
 0x3db   : > { %v2566_v49 = vpop.trf.xlu0 }
 0x3dc   : > { %v2742_v38 = vcombine.low %v2686_v59, %v2702_v55  ;;  %v2743_v54 = vcombine.high %v2686_v59, %v2702_v55  ;;  %v2759_v9 = vcombine.high %v2693_v30, %v2709_v28  ;;  %v2758_v20 = vcombine.low %v2693_v30, %v2709_v28 }
 0x3de   : > { %v2662_v1 = vpop.trf.xlu1  ;;  %v2757_v63 = vrot.slane %v2743_v54, %v2749_v24  ;;  %v2750_v2 = vrot.slane %v2742_v38, %v2749_v24  ;;  %v2773_v22 = vrot.slane %v2759_v9, %v2749_v24  ;;  %v2766_v33 = vrot.slane %v2758_v20, %v2749_v24 }
 0x3df   : > { %v2726_v4 = vcombine.low %v2598_v48, %v2662_v1  ;;  %v2727_v11 = vcombine.high %v2598_v48, %v2662_v1  ;;  %v2630_v13 = vpop.trf.xlu0 }
 0x3e0   : > { %v2710_v17 = vcombine.low %v2566_v49, %v2630_v13  ;;  %v2711_v18 = vcombine.high %v2566_v49, %v2630_v13 }
 0x3e1   : > { %v2734_v32 = vrot.slane %v2726_v4, %v2685_v42  ;;  %v2741_v21 = vrot.slane %v2727_v11, %v2685_v42 }
 0x3e2   : > { %v2718_v56 = vrot.slane %v2710_v17, %v2685_v42  ;;  %v2725_v58 = vrot.slane %v2711_v18, %v2685_v42 }
 0x3e4   : > { %v2774_v60 = vcombine.low %v2718_v56, %v2734_v32  ;;  %v2775_v61 = vcombine.high %v2718_v56, %v2734_v32  ;;  %v2791_v62 = vcombine.high %v2725_v58, %v2741_v21  ;;  %v2790_v5 = vcombine.low %v2725_v58, %v2741_v21 }
 0x3e6   : > { %v2789_v0 = vrot.slane %v2775_v61, %v2749_v24  ;;  %v2782_v3 = vrot.slane %v2774_v60, %v2749_v24  ;;  %v2805_v16 = vrot.slane %v2791_v62, %v2749_v24  ;;  %v2798_v26 = vrot.slane %v2790_v5, %v2749_v24 }
 0x3e8   : > { %v2808_v12 = vcombine.low %v2757_v63, %v2789_v0  ;;  %v2807_v14 = vcombine.high %v2750_v2, %v2782_v3  ;;  %v2806_v19 = vcombine.low %v2750_v2, %v2782_v3  ;;  %v2809_v23 = vcombine.high %v2757_v63, %v2789_v0 }
 0x3e9   : > { %v2812_v25 = vcombine.low %v2773_v22, %v2805_v16  ;;  %v2810_v36 = vcombine.low %v2766_v33, %v2798_v26  ;;  %v2811_v43 = vcombine.high %v2766_v33, %v2798_v26  ;;  %v2813_v45 = vcombine.high %v2773_v22, %v2805_v16 }
 0x3ea   : > { %2819 = vrot.lane.b32.xlu1 %v2808_v12, %s3764_s29  ;;  %2815 = vrot.lane.b32.xlu0 %v2807_v14, %s3765_s30  ;;  %s3679_s29 = sshll.u32 %s3771_s28, 4  ;;  %s3680_s29 = int_to_ptr.vmem [resolvable:$false] %s3679_s29 }
 0x3eb   : > { %s3681_s30 = scalar_lea.vmem %s3680_s29, 256  ;;  %p3682_p6 = scmp.lt.s32.totalorder %s4326_s9, %s3680_s29 }
 0x3ec   : > { %p3683_p13 = scmp.lt.s32.totalorder %s3681_s30, %s3675_s23 }
 0x3ee   : > { %2823 = vrot.lane.b32.xlu1 %v2809_v23, %s3766_s4  ;;  %2835 = vrot.lane.b32.xlu0 %v2812_v25, %s3767_s5  ;;  %p3684_p2 = por %p3683_p13, %p3682_p6 }
 0x3f0   : > { %p3685_p5 = pnand %p3684_p2, %p3678_p0 }
 0x3f2   : > { %2827 = vrot.lane.b32.xlu1 %v2810_v36, %s3768_s7 }
 0x3f6   : > { %2831 = vrot.lane.b32.xlu1 %v2811_v43, %s3769_s18 }
 0x3fa   : > { %2839 = vrot.lane.b32.xlu1 %v2813_v45, %s3770_s19 }
 0x45c   : > { %v2820_v46 = vpop.permute.xlu1 %2819  ;;  %v2816_v52 = vpop.permute.xlu0 %2815 }
 0x45d   : > { %v2843_v7 = vsel %vm2842_vm1, %v2806_v19, %v2816_v52 }
 0x45e   : > { %v2844_v10 = vsel %vm227_vm0, %v2843_v7, %v2820_v46 }
 0x460   : > { %v2824_v57 = vpop.permute.xlu1 %2823  ;;  %v2836_v31 = vpop.permute.xlu0 %2835 }
 0x461   : > { %v2846_v6 = vsel %vm2845_vm2, %v2844_v10, %v2824_v57 }
 0x464   : > { %v2828_v8 = vpop.permute.xlu1 %2827 }
 0x465   : > { %v2848_v15 = vsel %vm2847_vm3, %v2846_v6, %v2828_v8 }
 0x468   : > { %v2832_v27 = vpop.permute.xlu1 %2831 }
 0x469   : > { %v2850_v29 = vsel %vm2849_vm4, %v2848_v15, %v2832_v27 }
 0x46a   : > { %v2852_v35 = vsel %vm2851_vm5, %v2850_v29, %v2836_v31 }
 0x46c   : > { %v2840_v34 = vpop.permute.xlu1 %2839 }
 0x46d   : > { %v2854_v37 = vsel %vm2853_vm6, %v2852_v35, %v2840_v34 }
 0x46e   : > { %2856 = vst.msk [vmem:[%s207_s8] sm:$0xff] %vm2855_vm7, %v2854_v37 }
 0x46f   : > { %3688 = shalt.err (!%p3685_p5)
}
 0x470   : > { %s3689_s11 = scalar_lea.hbm %s4324_s22, 128  ;;  %s3693_s7 = scalar_lea.hbm %s4376_s3, 256 }
 0x471   : > { %p3690_p4 = scmp.ne.s32.totalorder %s4324_s22, %s3689_s11  ;;  %p3694_p12 = scmp.lt.u32.totalorder %s4324_s22, %s4376_s3 }
 0x472   : > { %p3695_p1 = scmp.lt.u32.totalorder %s3693_s7, %s3689_s11  ;;  %p3697_p8 = scmp.lt.u32.totalorder %s3689_s11, %s4324_s22 }
 0x473   : > { %p3691_p7 = pnand %p3690_p4, %p4384_p9 }
 0x474   : > { %p3696_p3 = por %p3695_p1, %p3694_p12 }
 0x475   : > { %p3692_p10 = pneg %p3691_p7 }
 0x476   : > { %p3698_p11 = por %p3697_p8, %p3696_p3 }
 0x478   : > { %p3699_p0 = pnand %p3698_p11, %p3692_p10 }
 0x47a   : > { %3702 = shalt.err (!%p3699_p0)
}
 0x47b   : > { %3573 = dma.vmem_to_hbm [thread:$0]  (%p4384_p9), %s4326_s9, 128, %s4324_s22, %s2858_s15  }
 0x47c PF: > { %s2884_s21 = sand.u32 1, %s3737_s12   ;;  %p4385_p6 = scmp.ne.s32.totalorder %s4381_s27, 0 }
 0x47d   : > { %p4386_p13 = scmp.ge.s32.totalorder %s3757_s17, 2  ;;  %s2885_s6 = scalar_lea.sflag [#allocation4], %s2884_s21 }
 0x47f   : > { %p3580_p2 = pnand %p4386_p13, %p4385_p6 }
 0x481   : > { %3732 = dma.done.wait (!%p3580_p2), %s2885_s6, 128  }
 0x482   : > { %3734 = vsyncadd (!%p3580_p2), %s2885_s6, 4294967168  ;;  %s19_s17 = sadd.s32 1, %s3757_s17   ;;  %s4387_s12 = smov %s3741_s13 }
 0x483   : > { %p16_p5 = scmp.ge.s32.totalorder %s19_s17, 4   ;;  %s4388_s13 = smov %s3745_s14 }
 0x484   : > { %s4389_s14 = smov %s3848_s26  ;;  %s4390_s15 = smov %s3753_s16 }
 0x485   : > { %s4391_s16 = smov %s4393_s20  ;;  %18 = sbr.rel (!%p16_p5) target bundleno = 6 (0x6), region = 77 }
 0x48c   :  { %2890 = vsyncpa [#allocation3], 1 }
 0x48d   :  { %2892 = vsyncpa [#allocation3 + $0x1], 1 }
 0x48e   :  { %2893 = vsyncpa [#allocation4], 1 }
 0x48f   :  { %2895 = vsyncpa [#allocation4 + $0x1], 1 }

</bundles_post_ra>
